<compile_context>
chip_gen: v5e
topology: v5e:2x2
jax: 0.10.0
libtpu: 0.0.40
codegen_flags: <defaults>
</compile_context>

<pallas_src>
import math

import jax
import jax.numpy as jnp
from jax.experimental import pallas as pl
from jax.experimental.pallas import tpu as pltpu


def _round_up(x, m):
    return ((x + m - 1) // m) * m


def _device_vmem_capacity():
    """Physical VMEM bytes per core; conservative fallback = v7x (64 MiB)."""
    try:
        cap = getattr(pltpu.get_tpu_info(), "vmem_capacity_bytes", None)
        if cap:
            return int(cap)
    except Exception:
        pass
    return 64 << 20


def _pick_tile(dim, target, unit=128):
    """Largest power-of-two multiple of `unit` (<= target) whose padding of
    `dim` wastes less than half a tile beyond the minimal `unit` padding."""
    dim_u = _round_up(dim, unit)
    best = unit
    t = unit * 2
    while t <= target:
        if _round_up(dim_u, t) - dim_u < t // 2:
            best = t
        t *= 2
    return best


def _vmem_bytes(tm, tn, tk, in_bpe, out_bpe):
    """Double-buffered working-set estimate for the pipeline."""
    return (2 * tm * tk * in_bpe          # x tile (double buffered)
            + 2 * 2 * tk * tn * in_bpe    # W1 + W2 tiles (double buffered)
            + 2 * 2 * tn * 4              # biases (f32)
            + 2 * tm * tn * out_bpe       # out tile (double buffered)
            + 2 * tm * tn * 4)            # two f32 accumulators (scratch)


def _prep2d(a, rows, cols, dtype):
    """Cast + zero-pad only when needed (avoid extra HBM passes)."""
    if a.dtype != dtype:
        a = a.astype(dtype)
    pr, pc = rows - a.shape[0], cols - a.shape[1]
    if pr or pc:
        a = jnp.pad(a, ((0, pr), (0, pc)))
    return a


def _glu_kernel(x_ref, w1_ref, b1_ref, w2_ref, b2_ref, o_ref,
                acc1_ref, acc2_ref):
    k = pl.program_id(2)

    @pl.when(k == 0)
    def _init():
        # Fold bias into the accumulator init (epilogue adds become free).
        acc1_ref[...] = jnp.broadcast_to(b1_ref[...], acc1_ref.shape)
        acc2_ref[...] = jnp.broadcast_to(b2_ref[...], acc2_ref.shape)

    x = x_ref[...]
    # bf16 x bf16 -> f32 accumulation on the MXU.
    acc1_ref[...] += jnp.dot(x, w1_ref[...], preferred_element_type=jnp.float32)
    acc2_ref[...] += jnp.dot(x, w2_ref[...], preferred_element_type=jnp.float32)

    @pl.when(k == pl.num_programs(2) - 1)
    def _epilogue():
        o_ref[...] = (jax.nn.sigmoid(acc1_ref[...]) * acc2_ref[...]
                      ).astype(o_ref.dtype)


def glu_forward(x, w1, b1, w2, b2, *, tm=1024, tn=1024, tk=512,
                compute_dtype=jnp.bfloat16, out_dtype=None):
    """x: (..., H). w1/w2: (H, H) laid out for x @ W. b1/b2: (H,)."""
    orig_shape = x.shape
    H = orig_shape[-1]
    if out_dtype is None:
        out_dtype = x.dtype
    x2d = x.reshape(-1, H)
    M = x2d.shape[0]

    in_bpe = jnp.dtype(compute_dtype).itemsize
    out_bpe = jnp.dtype(out_dtype).itemsize

    # ---------------- tile selection ----------------
    tn_eff = _pick_tile(H, tn)            # power-of-two multiple of 128
    tk_eff = _pick_tile(H, tk)            # power-of-two multiple of 128
    M_u8 = _round_up(M, 8)
    tm_eff = M_u8 if M_u8 <= tm else _pick_tile(M, tm)

    # Shrink tiles until the double-buffered working set fits VMEM
    # (v7x: 64 MiB physical per core; leave headroom for compiler scratch).
    vmem_cap = _device_vmem_capacity()
    budget = max(vmem_cap - (12 << 20), 16 << 20)
    while _vmem_bytes(tm_eff, tn_eff, tk_eff, in_bpe, out_bpe) > budget:
        if tn_eff >= tk_eff and tn_eff >= 256:
            tn_eff //= 2
        elif tk_eff >= 256:
            tk_eff //= 2
        elif tm_eff >= 256 and tm_eff % 256 == 0:
            tm_eff //= 2
        else:
            break

    # tn_eff / tk_eff are power-of-two multiples of 128, so the larger is a
    # common multiple -> no silent grid truncation for ragged H (bug fix).
    h_unit = max(tn_eff, tk_eff)
    H_pad = _round_up(H, h_unit)
    M_pad = _round_up(M, tm_eff)

    # v7x has 2 TensorCores: make sure at least one "parallel" grid axis has
    # >= 2 blocks so both cores get work.
    if (M_pad // tm_eff) * (H_pad // tn_eff) == 1 and tm_eff % 256 == 0:
        tm_eff //= 2
        M_pad = _round_up(M, tm_eff)

    # ---------------- operand prep (no-op when already aligned/bf16) --------
    # TODO(synk): for production, store the weights in compute_dtype at init so
    # this cast never materializes an extra HBM copy per forward.
    x_p = _prep2d(x2d, M_pad, H_pad, compute_dtype)
    w1_p = _prep2d(w1, H_pad, H_pad, compute_dtype)
    w2_p = _prep2d(w2, H_pad, H_pad, compute_dtype)
    b1_p = _prep2d(b1.reshape(1, -1), 1, H_pad, jnp.float32)
    b2_p = _prep2d(b2.reshape(1, -1), 1, H_pad, jnp.float32)

    grid = (M_pad // tm_eff, H_pad // tn_eff, H_pad // tk_eff)
    m_blocks, n_blocks, _ = grid

    vmem_est = _vmem_bytes(tm_eff, tn_eff, tk_eff, in_bpe, out_bpe)
    vmem_limit = int(min(max(2 * vmem_est, 32 << 20), vmem_cap - (8 << 20)))

    cost = pl.CostEstimate(
        flops=2 * 2 * M_pad * H_pad * H_pad,              # two matmuls
        transcendentals=M_pad * H_pad,                    # sigmoid
        bytes_accessed=int(
            n_blocks * M_pad * H_pad * in_bpe             # x re-read per j
            + m_blocks * 2 * H_pad * H_pad * in_bpe       # W1+W2 re-read per i
            + m_blocks * 2 * H_pad * 4                    # biases
            + M_pad * H_pad * out_bpe),                   # out
    )

    out = pl.pallas_call(
        _glu_kernel,
        out_shape=jax.ShapeDtypeStruct((M_pad, H_pad), out_dtype),
        grid_spec=pltpu.PrefetchScalarGridSpec(
            num_scalar_prefetch=0,
            grid=grid,
            in_specs=[
                pl.BlockSpec((tm_eff, tk_eff), lambda i, j, k: (i, k)),  # x
                pl.BlockSpec((tk_eff, tn_eff), lambda i, j, k: (k, j)),  # W1
                pl.BlockSpec((1, tn_eff), lambda i, j, k: (0, j)),       # b1
                pl.BlockSpec((tk_eff, tn_eff), lambda i, j, k: (k, j)),  # W2
                pl.BlockSpec((1, tn_eff), lambda i, j, k: (0, j)),       # b2
            ],
            out_specs=pl.BlockSpec((tm_eff, tn_eff), lambda i, j, k: (i, j)),
            scratch_shapes=[
                pltpu.VMEM((tm_eff, tn_eff), jnp.float32),
                pltpu.VMEM((tm_eff, tn_eff), jnp.float32),
            ],
        ),
        compiler_params=pltpu.CompilerParams(
            dimension_semantics=("parallel", "parallel", "arbitrary"),
            vmem_limit_bytes=vmem_limit,
        ),
        cost_estimate=cost,
    )(x_p, w1_p, b1_p, w2_p, b2_p)

    return out[:M, :H].reshape(orig_shape)


def init_glu_params(key, input_size, dtype=jnp.float32):
    """Matches create_linear: kaiming_normal_(relu), bias = 0.
    Weights returned pre-transposed to (in, out) for x @ W."""
    k1, k2 = jax.random.split(key)
    std = math.sqrt(2.0 / input_size)  # fan_in = input_size, gain = sqrt(2)
    w1 = (jax.random.normal(k1, (input_size, input_size)) * std).astype(dtype)
    w2 = (jax.random.normal(k2, (input_size, input_size)) * std).astype(dtype)
    b1 = jnp.zeros((input_size,), dtype)
    b2 = jnp.zeros((input_size,), dtype)
    return w1, b1, w2, b2


if __name__ == "__main__":
    key = jax.random.PRNGKey(0)
    k_x, k_p = jax.random.split(key)

    batch, seq, hidden = 2, 8, 32
    x = jax.random.normal(k_x, (batch, seq, hidden), dtype=jnp.float32)
    w1, b1, w2, b2 = init_glu_params(k_p, hidden)

    out = glu_forward(x, w1, b1, w2, b2)
    out = jax.block_until_ready(out)

    # reference check in plain JAX (f32); kernel matmuls run in bf16 so allow
    # bf16-level tolerance.
    ref = jax.nn.sigmoid(x @ w1 + b1) * (x @ w2 + b2)
    assert out.shape == x.shape
    assert out.dtype == x.dtype
    assert jnp.allclose(out, ref, atol=2e-2, rtol=2e-2), (
        float(jnp.max(jnp.abs(out - ref))))

    print("KERNEL_OK")
</pallas_src>

<mosaic_0001>
module attributes {stable_mosaic.version = 11 : i64} {
  func.func @_glu_kernel(%arg0: i32, %arg1: i32, %arg2: i32, %arg3: memref<16x128xbf16, #tpu.memory_space<vmem>>, %arg4: memref<128x128xbf16, #tpu.memory_space<vmem>>, %arg5: memref<1x128xf32, #tpu.memory_space<vmem>>, %arg6: memref<128x128xbf16, #tpu.memory_space<vmem>>, %arg7: memref<1x128xf32, #tpu.memory_space<vmem>>, %arg8: memref<16x128xf32, #tpu.memory_space<vmem>>, %arg9: memref<16x128xf32, #tpu.memory_space<vmem>>, %arg10: memref<16x128xf32, #tpu.memory_space<vmem>>) attributes {dimension_semantics = [#tpu.dimension_semantics<parallel>, #tpu.dimension_semantics<parallel>, #tpu.dimension_semantics<arbitrary>], iteration_bounds = array<i64: 1, 1, 1>, scalar_prefetch = 0 : i64, scratch_operands = 2 : i64, tpu.core_type = #tpu.core_type<tc>, window_params = [{transform_indices = @transform_0, window_bounds = array<i64: 16, 128>}, {transform_indices = @transform_1, window_bounds = array<i64: 128, 128>}, {transform_indices = @transform_2, window_bounds = array<i64: 1, 128>}, {transform_indices = @transform_3, window_bounds = array<i64: 128, 128>}, {transform_indices = @transform_4, window_bounds = array<i64: 1, 128>}, {transform_indices = @transform_5, window_bounds = array<i64: 16, 128>}]} {
    %c0_i32 = arith.constant 0 : i32
    %0 = arith.cmpi eq, %arg2, %c0_i32 : i32
    %1 = arith.extui %0 : i1 to i32
    %c0_i32_0 = arith.constant 0 : i32
    %2 = arith.cmpi ne, %1, %c0_i32_0 : i32
    scf.if %2 {
      %c0_17 = arith.constant 0 : index
      %c0_18 = arith.constant 0 : index
      %17 = vector.load %arg5[%c0_17, %c0_18] : memref<1x128xf32, #tpu.memory_space<vmem>>, vector<1x128xf32>
      %18 = vector.shape_cast %17 : vector<1x128xf32> to vector<1x128xf32>
      %19 = vector.broadcast %18 : vector<1x128xf32> to vector<16x128xf32>
      %c0_19 = arith.constant 0 : index
      %c0_20 = arith.constant 0 : index
      %20 = vector.load %arg9[%c0_19, %c0_20] : memref<16x128xf32, #tpu.memory_space<vmem>>, vector<16x128xf32>
      tpu.vector_store %arg9[%c0_19, %c0_20], %19 {strides = array<i32>} : memref<16x128xf32, #tpu.memory_space<vmem>>, vector<16x128xf32>,
      %c0_21 = arith.constant 0 : index
      %c0_22 = arith.constant 0 : index
      %21 = vector.load %arg7[%c0_21, %c0_22] : memref<1x128xf32, #tpu.memory_space<vmem>>, vector<1x128xf32>
      %22 = vector.shape_cast %21 : vector<1x128xf32> to vector<1x128xf32>
      %23 = vector.broadcast %22 : vector<1x128xf32> to vector<16x128xf32>
      %c0_23 = arith.constant 0 : index
      %c0_24 = arith.constant 0 : index
      %24 = vector.load %arg10[%c0_23, %c0_24] : memref<16x128xf32, #tpu.memory_space<vmem>>, vector<16x128xf32>
      tpu.vector_store %arg10[%c0_23, %c0_24], %23 {strides = array<i32>} : memref<16x128xf32, #tpu.memory_space<vmem>>, vector<16x128xf32>,
    } else {
    }
    %c0 = arith.constant 0 : index
    %c0_1 = arith.constant 0 : index
    %3 = vector.load %arg3[%c0, %c0_1] : memref<16x128xbf16, #tpu.memory_space<vmem>>, vector<16x128xbf16>
    %c0_2 = arith.constant 0 : index
    %c0_3 = arith.constant 0 : index
    %4 = vector.load %arg9[%c0_2, %c0_3] : memref<16x128xf32, #tpu.memory_space<vmem>>, vector<16x128xf32>
    %c0_4 = arith.constant 0 : index
    %c0_5 = arith.constant 0 : index
    %5 = vector.load %arg4[%c0_4, %c0_5] : memref<128x128xbf16, #tpu.memory_space<vmem>>, vector<128x128xbf16>
    %cst = arith.constant dense<0.000000e+00> : vector<16x128xf32>
    %6 = tpu.matmul %3, %5, %cst {dimension_numbers = #tpu.dot_dimension_numbers<[1], [0], [0], [1], [0, 0, 1, 1], [], []>} : vector<16x128xbf16>, vector<128x128xbf16>, vector<16x128xf32> -> vector<16x128xf32>
    %7 = arith.addf %4, %6 : vector<16x128xf32>
    %c0_6 = arith.constant 0 : index
    %c0_7 = arith.constant 0 : index
    %8 = vector.load %arg9[%c0_6, %c0_7] : memref<16x128xf32, #tpu.memory_space<vmem>>, vector<16x128xf32>
    tpu.vector_store %arg9[%c0_6, %c0_7], %7 {strides = array<i32>} : memref<16x128xf32, #tpu.memory_space<vmem>>, vector<16x128xf32>,
    %c0_8 = arith.constant 0 : index
    %c0_9 = arith.constant 0 : index
    %9 = vector.load %arg10[%c0_8, %c0_9] : memref<16x128xf32, #tpu.memory_space<vmem>>, vector<16x128xf32>
    %c0_10 = arith.constant 0 : index
    %c0_11 = arith.constant 0 : index
    %10 = vector.load %arg6[%c0_10, %c0_11] : memref<128x128xbf16, #tpu.memory_space<vmem>>, vector<128x128xbf16>
    %cst_12 = arith.constant dense<0.000000e+00> : vector<16x128xf32>
    %11 = tpu.matmul %3, %10, %cst_12 {dimension_numbers = #tpu.dot_dimension_numbers<[1], [0], [0], [1], [0, 0, 1, 1], [], []>} : vector<16x128xbf16>, vector<128x128xbf16>, vector<16x128xf32> -> vector<16x128xf32>
    %12 = arith.addf %9, %11 : vector<16x128xf32>
    %c0_13 = arith.constant 0 : index
    %c0_14 = arith.constant 0 : index
    %13 = vector.load %arg10[%c0_13, %c0_14] : memref<16x128xf32, #tpu.memory_space<vmem>>, vector<16x128xf32>
    tpu.vector_store %arg10[%c0_13, %c0_14], %12 {strides = array<i32>} : memref<16x128xf32, #tpu.memory_space<vmem>>, vector<16x128xf32>,
    %c0_i32_15 = arith.constant 0 : i32
    %14 = arith.cmpi eq, %arg2, %c0_i32_15 : i32
    %15 = arith.extui %14 : i1 to i32
    %c0_i32_16 = arith.constant 0 : i32
    %16 = arith.cmpi ne, %15, %c0_i32_16 : i32
    scf.if %16 {
      %c0_17 = arith.constant 0 : index
      %c0_18 = arith.constant 0 : index
      %17 = vector.load %arg9[%c0_17, %c0_18] : memref<16x128xf32, #tpu.memory_space<vmem>>, vector<16x128xf32>
      %18 = arith.negf %17 : vector<16x128xf32>
      %19 = math.exp %18 : vector<16x128xf32>
      %cst_19 = arith.constant 1.000000e+00 : f32
      %20 = vector.broadcast %cst_19 : f32 to vector<16x128xf32>
      %21 = arith.addf %20, %19 : vector<16x128xf32>
      %22 = arith.divf %20, %21 : vector<16x128xf32>
      %c0_20 = arith.constant 0 : index
      %c0_21 = arith.constant 0 : index
      %23 = vector.load %arg10[%c0_20, %c0_21] : memref<16x128xf32, #tpu.memory_space<vmem>>, vector<16x128xf32>
      %24 = arith.mulf %22, %23 : vector<16x128xf32>
      %c0_22 = arith.constant 0 : index
      %c0_23 = arith.constant 0 : index
      %25 = vector.load %arg8[%c0_22, %c0_23] : memref<16x128xf32, #tpu.memory_space<vmem>>, vector<16x128xf32>
      tpu.vector_store %arg8[%c0_22, %c0_23], %24 {strides = array<i32>} : memref<16x128xf32, #tpu.memory_space<vmem>>, vector<16x128xf32>,
    } else {
    }
    return
  }
  func.func @transform_0(%arg0: i32, %arg1: i32, %arg2: i32) -> (i32, i32) {
    %c0_i32 = arith.constant 0 : i32
    return %arg0, %arg2 : i32, i32
  }
  func.func @transform_1(%arg0: i32, %arg1: i32, %arg2: i32) -> (i32, i32) {
    %c0_i32 = arith.constant 0 : i32
    return %arg2, %arg1 : i32, i32
  }
  func.func @transform_2(%arg0: i32, %arg1: i32, %arg2: i32) -> (i32, i32) {
    %c0_i32 = arith.constant 0 : i32
    %c0_i32_0 = arith.constant 0 : i32
    return %c0_i32, %arg1 : i32, i32
  }
  func.func @transform_3(%arg0: i32, %arg1: i32, %arg2: i32) -> (i32, i32) {
    %c0_i32 = arith.constant 0 : i32
    return %arg2, %arg1 : i32, i32
  }
  func.func @transform_4(%arg0: i32, %arg1: i32, %arg2: i32) -> (i32, i32) {
    %c0_i32 = arith.constant 0 : i32
    %c0_i32_0 = arith.constant 0 : i32
    return %c0_i32, %arg1 : i32, i32
  }
  func.func @transform_5(%arg0: i32, %arg1: i32, %arg2: i32) -> (i32, i32) {
    %c0_i32 = arith.constant 0 : i32
    return %arg0, %arg1 : i32, i32
  }
}

</mosaic_0001>

<bundles_post_ra>
// kernel: tpu_custom_call.1
= control target key start
LH: loop header
LB: loop body
LE: loop exit
PB: predicated region body
PF: predicated region fallthrough
CT: control target
= control target key end

     0   :  { %10 = vsyncpa [#allocation5], 0  ;;  %s592_s0 = inlined_call_operand.hbm [shape: bf16[16,128], index: 0, kind: input, shape index: {}]   ;;  %s593_s1 = inlined_call_operand.hbm [shape: bf16[128,128], index: 1, kind: input, shape index: {}]   ;;  %s594_s2 = inlined_call_operand.vmem [shape: f32[1,128], index: 2, kind: input, shape index: {}]   ;;  %s595_s3 = inlined_call_operand.hbm [shape: bf16[128,128], index: 3, kind: input, shape index: {}]   ;;  %s596_s4 = inlined_call_operand.vmem [shape: f32[1,128], index: 4, kind: input, shape index: {}]   ;;  %s597_s5 = inlined_call_operand.hbm [shape: f32[16,128], index: 5, kind: output, shape index: {}]  }
   0x1   :  { %11 = vsyncpa [#allocation8], 0 }
   0x2   :  { %12 = vsyncpa [#allocation6], 0  ;;  %s30_s20 = sshll.u32 %s593_s1, 4  ;;  %s536_s21 = smov [#allocation7]   ;;  %s31_s20 = int_to_ptr.hbm [resolvable:$true] %s30_s20 }
   0x3   :  { %s32_s22 = sshll.u32 %s536_s21, 4  ;;  %s17_s25 = sshll.u32 %s592_s0, 4  ;;  %s33_s22 = int_to_ptr.vmem [resolvable:$true] %s32_s22  ;;  %s18_s25 = int_to_ptr.hbm [resolvable:$true] %s17_s25 }
   0x4   :  { %s537_s26 = smov 64   ;;  %s538_s27 = smov 4  }
   0x5   :  { %38 = dma.hbm_to_vmem [thread:$0]  %s31_s20, 1024, %s33_s22, [#allocation8], %s537_s26, %s537_s26, %s538_s27  }
   0x6   :  { %s539_s28 = smov [#allocation4]   ;;  %s45_s7 = sshll.u32 %s595_s3, 4  ;;  %s46_s7 = int_to_ptr.hbm [resolvable:$true] %s45_s7 }
   0x7   :  { %s19_s29 = sshll.u32 %s539_s28, 4  ;;  %s540_s1 = smov [#allocation9]   ;;  %s20_s29 = int_to_ptr.vmem [resolvable:$true] %s19_s29 }
   0x8   :  { %25 = dma.hbm_to_vmem [thread:$0]  %s18_s25, 128, %s20_s29, [#allocation5], %s537_s26, %s537_s26, %s538_s27  }
   0x9   :  { %s47_s8 = sshll.u32 %s540_s1, 4  ;;  %s48_s8 = int_to_ptr.vmem [resolvable:$true] %s47_s8 }
   0xa   :  { %53 = dma.hbm_to_vmem [thread:$0]  %s46_s7, 1024, %s48_s8, [#allocation8], %s537_s26, %s537_s26, %s538_s27  }
   0xb   :  { %530 = dma.done.wait [#allocation5], 128  }
   0xc   :  { %531 = vsyncadd [#allocation5], 4294967168 }
   0xd   :  { %532 = dma.done.wait [#allocation8], 2048  }
   0xe   :  { %533 = vsyncadd [#allocation8], 4294965248  ;;  %v407_v0 = vld [vmem:[#allocation7 + $0x38] sm:$0xff]  ;;  %v406_v1 = vld [vmem:[#allocation7 + $0x30] sm:$0xff]  ;;  %s315_s13 = sshll.u32 %s597_s5, 4  ;;  %s542_s14 = smov 128   ;;  %s316_s13 = int_to_ptr.hbm [resolvable:$true] %s315_s13 }
   0xf   :  { %158 = vmatpush.bf16.msra.mxu0 %v407_v0  ;;  %v415_v2 = vld [vmem:[#allocation9 + $0x38] sm:$0xff]  ;;  %v414_v3 = vld [vmem:[#allocation9 + $0x30] sm:$0xff]  ;;  %v405_v4 = vld [vmem:[#allocation7 + $0x28] sm:$0xff]  ;;  %s543_s15 = smov 8  }
  0x10   :  { %242 = vmatpush.bf16.msra.mxu1 %v415_v2  ;;  %v413_v5 = vld [vmem:[#allocation9 + $0x28] sm:$0xff]  ;;  %v404_v6 = vld [vmem:[#allocation7 + $0x20] sm:$0xff]  ;;  %v403_v8 = vld [vmem:[#allocation7 + $0x18] sm:$0xff] }
  0x11   :  { %v412_v7 = vld [vmem:[#allocation9 + $0x20] sm:$0xff]  ;;  %v411_v9 = vld [vmem:[#allocation9 + $0x18] sm:$0xff]  ;;  %v402_v10 = vld [vmem:[#allocation7 + $0x10] sm:$0xff] }
  0x12   :  { %v410_v11 = vld [vmem:[#allocation9 + $0x10] sm:$0xff]  ;;  %v401_v12 = vld [vmem:[#allocation7 + $0x8] sm:$0xff]  ;;  %v400_v14 = vld [vmem:[#allocation7] sm:$0xff] }
  0x13   :  { %159 = vmatpush.bf16.msra.mxu0 %v406_v1  ;;  %v409_v13 = vld [vmem:[#allocation9 + $0x8] sm:$0xff]  ;;  %v408_v15 = vld [vmem:[#allocation9] sm:$0xff]  ;;  %v399_v16 = vld [vmem:[#allocation4] sm:$0xff] }
  0x14   :  { %243 = vmatpush.bf16.msra.mxu1 %v414_v3  ;;  %v424_v17 = vld [vmem:[%s594_s2] ss:$0 sm:$0xff]  ;;  %s541_s2 = smov [#allocation10]  }
  0x15   :  { %v425_v30 = vld [vmem:[%s596_s4] ss:$0 sm:$0xff]  ;;  %s313_s4 = sshll.u32 %s541_s2, 4  ;;  %s314_s4 = int_to_ptr.vmem [resolvable:$true] %s313_s4 }
  0x17   :  { %160 = vmatpush.bf16.msra.mxu0 %v405_v4 }
  0x18   :  { %244 = vmatpush.bf16.msra.mxu1 %v413_v5 }
  0x1b   :  { %161 = vmatpush.bf16.msra.mxu0 %v404_v6 }
  0x1c   :  { %245 = vmatpush.bf16.msra.mxu1 %v412_v7 }
  0x1f   :  { %162 = vmatpush.bf16.msra.mxu0 %v403_v8 }
  0x20   :  { %246 = vmatpush.bf16.msra.mxu1 %v411_v9 }
  0x23   :  { %163 = vmatpush.bf16.msra.mxu0 %v402_v10 }
  0x24   :  { %247 = vmatpush.bf16.msra.mxu1 %v410_v11 }
  0x27   :  { %164 = vmatpush.bf16.msra.mxu0 %v401_v12 }
  0x28   :  { %248 = vmatpush.bf16.msra.mxu1 %v409_v13 }
  0x2b   :  { %165 = vmatpush.bf16.msra.mxu0 %v400_v14 }
  0x2c   :  { %249 = vmatpush.bf16.msra.mxu1 %v408_v15 }
  0x2e   :  { %166 = vmatmul.bf16.vlgmr.msra.gmra.mxu0 %v399_v16 }
  0x2f   :  { %250 = vmatmul.bf16.vlgmr.msra.gmra.mxu1 %v399_v16 }
  0xab   :  { %v167_v18 = vpop.f32.mrf.mxu0 }
  0xac   :  { %v172_v19 = vadd.f32 %v424_v17, %v167_v18  ;;  %v251_v32 = vpop.f32.mrf.mxu1 }
  0xad   :  { %v256_v36 = vadd.f32 %v425_v30, %v251_v32 }
  0xae   :  { %v397_v20 = vmul.f32 -1.442695, %v172_v19 }
  0xb0   :  { %426 = vpow2.f32 %v397_v20 }
  0xb3   :  { %v169_v21 = vpop.f32.mrf.mxu0 }
  0xb4   :  { %v173_v22 = vadd.f32 %v424_v17, %v169_v21  ;;  %v253_v48 = vpop.f32.mrf.mxu1 }
  0xb5   :  { %v257_v51 = vadd.f32 %v425_v30, %v253_v48 }
  0xb6   :  { %v427_v23 = vpop.eup %426  ;;  %v398_v24 = vmul.f32 -1.442695, %v173_v22 }
  0xb7   :  { %v271_v25 = vadd.f32 1.0, %v427_v23 }
  0xb8   :  { %428 = vpow2.f32 %v398_v24 }
  0xb9   :  { %430 = vrcp.f32 %v271_v25  ;;  %v284_v33 = vand.u32 2147483648, %v271_v25  ;;  %v282_v35 = vand.u32 2147483647, %v271_v25  ;;  %vm278_vm1 = vweird.f32 %v271_v25 }
  0xbb   :  { %v285_v39 = vor.u32 1.1754944e-38, %v284_v33  ;;  %vm283_vm3 = vcmp.eq.f32.partialorder %v282_v35, 8.507059e+37 }
  0xbe   :  { %v429_v26 = vpop.eup %428 }
  0xbf   :  { %v431_v27 = vpop.eup %430  ;;  %v272_v28 = vadd.f32 1.0, %v429_v26 }
  0xc0   :  { %v274_v29 = vmul.f32 %v431_v27, %v271_v25  ;;  %vm279_vm0 = vweird.f32 %v431_v27 }
  0xc1   :  { %432 = vrcp.f32 %v272_v28  ;;  %vm280_vm2 = vmor %vm278_vm1, %vm279_vm0  ;;  %v299_v45 = vand.u32 2147483648, %v272_v28  ;;  %v297_v47 = vand.u32 2147483647, %v272_v28  ;;  %vm293_vm5 = vweird.f32 %v272_v28 }
  0xc2   :  { %v275_v31 = vsub.f32 1.0, %v274_v29 }
  0xc3   :  { %v300_v50 = vor.u32 1.1754944e-38, %v299_v45  ;;  %vm298_vm7 = vcmp.eq.f32.partialorder %v297_v47, 8.507059e+37 }
  0xc4   :  { %v276_v34 = vmul.f32 %v431_v27, %v275_v31 }
  0xc6   :  { %v277_v37 = vadd.f32 %v431_v27, %v276_v34 }
  0xc7   :  { %v433_v38 = vpop.eup %432 }
  0xc8   :  { %v281_v40 = vsel %vm280_vm2, %v431_v27, %v277_v37  ;;  %v289_v41 = vmul.f32 %v433_v38, %v272_v28  ;;  %vm294_vm4 = vweird.f32 %v433_v38 }
  0xc9   :  { %v286_v42 = vsel %vm283_vm3, %v285_v39, %v281_v40  ;;  %vm295_vm6 = vmor %vm293_vm5, %vm294_vm4 }
  0xca   :  { %v305_v43 = vmul.f32 %v286_v42, %v256_v36  ;;  %v290_v44 = vsub.f32 1.0, %v289_v41 }
  0xcc   :  { %307 = vst [vmem:[#allocation10] sm:$0xff] %v305_v43  ;;  %v291_v46 = vmul.f32 %v433_v38, %v290_v44 }
  0xce   :  { %v292_v49 = vadd.f32 %v433_v38, %v291_v46 }
  0xd0   :  { %v296_v52 = vsel %vm295_vm6, %v433_v38, %v292_v49 }
  0xd1   :  { %v301_v53 = vsel %vm298_vm7, %v300_v50, %v296_v52 }
  0xd2   :  { %v306_v54 = vmul.f32 %v301_v53, %v257_v51 }
  0xd4   :  { %308 = vst [vmem:[#allocation10 + $0x8] sm:$0xff] %v306_v54 }
  0xd5   :  { %321 = dma.vmem_to_hbm [thread:$0]  %s314_s4, 256, %s316_s13, [#allocation6], %s542_s14, %s542_s14, %s543_s15  }
  0xd6   :  { %534 = dma.done.wait [#allocation6], 256  }
  0xd7   :  { %535 = vsyncadd [#allocation6], 4294967040 }
  0xd8   :  { %326 = vsyncpa [#allocation5], 1 }
  0xd9   :  { %327 = vsyncpa [#allocation8], 1 }
  0xda   :  { %328 = vsyncpa [#allocation6], 1 }

</bundles_post_ra>
